<compile_context>
chip_gen: v5e
topology: v5e:2x2
jax: 0.10.0
libtpu: 0.0.40
codegen_flags: <defaults>
</compile_context>

<pallas_src>
import math
import functools

import jax
import jax.numpy as jnp
from jax import lax
from jax.experimental import pallas as pl
from jax.experimental.pallas import tpu as pltpu


def _round_up(x, m):
    return (x + m - 1) // m * m


def _embed_kernel(tok_ref, len_ref,                      # scalar prefetch (SMEM)
                  emb_hbm, pos_ref, gamma_ref, beta_ref,  # inputs
                  out_ref,                                # output block (TILE_S, E)
                  rows_ref, sem,                          # scratch: VMEM rows, DMA sem
                  *, embed_size, tile_s, s_pad, pre_norm, use_mask, eps=1e-5):
    st = pl.program_id(0)   # sequence-tile index
    b = pl.program_id(1)    # batch index (innermost)

    base = b * s_pad + st * tile_s

    # ---- DMA row gather: one small copy per token (traffic ~ B*S*E) -------
    # Note: token ids must satisfy 0 <= id < V (out-of-range ids would be an
    # OOB HBM DMA, analogous to nn.Embedding raising on bad indices).
    def _issue(i, carry):
        t = tok_ref[base + i]
        pltpu.make_async_copy(emb_hbm.at[t], rows_ref.at[i], sem.at[0]).start()
        return carry

    lax.fori_loop(0, tile_s, _issue, 0)

    def _drain(i, carry):
        # Per-row wait (same semaphore); robust regardless of completion order.
        pltpu.make_async_copy(emb_hbm.at[0], rows_ref.at[i], sem.at[0]).wait()
        return carry

    lax.fori_loop(0, tile_s, _drain, 0)

    # ---- scale + positional encoding (VPU, fully vectorized over the tile) --
    scale = jnp.float32(math.sqrt(embed_size))
    v = rows_ref[...] * scale + pos_ref[...]               # (TILE_S, E) f32

    if use_mask:
        s_idx = st * tile_s + lax.broadcasted_iota(jnp.int32, (tile_s, 1), 0)
        keep = (s_idx < len_ref[b]).astype(jnp.float32)    # (TILE_S, 1)
        v = v * keep

    # TODO(synk): dropout is identity here (inference mode).

    if pre_norm:
        mean = jnp.mean(v, axis=-1, keepdims=True)
        var = jnp.mean((v - mean) ** 2, axis=-1, keepdims=True)
        v = (v - mean) * lax.rsqrt(var + eps)
        v = v * gamma_ref[...] + beta_ref[...]

    out_ref[...] = v


def embedding_layer_forward(tokens, emb_table, pos_enc, gamma, beta,
                            input_lengths=None, pre_norm=False):
    """tokens: [B, S] int32; emb_table: [V, E]; pos_enc: [max_len, E];
    gamma/beta: [E]. Returns [B, S, E] float32."""
    B, S = tokens.shape
    V, E = emb_table.shape
    max_len = pos_enc.shape[0]
    if S > max_len:
        raise ValueError(f"seq_len {S} exceeds positional-encoding max_len {max_len}")

    # ---- sequence tiling: tile_s divides s_pad; s_pad == S when S % 8 == 0 --
    if S <= 128:
        s_pad = _round_up(S, 8)
        tile_s = s_pad
    else:
        s_pad = _round_up(S, 128)
        tile_s = 128
    num_s_tiles = s_pad // tile_s

    emb_f32 = emb_table.astype(jnp.float32)                            # stays in HBM
    pos_p = jnp.pad(pos_enc[:S].astype(jnp.float32), ((0, s_pad - S), (0, 0)))
    tok_p = jnp.pad(tokens.astype(jnp.int32),
                    ((0, 0), (0, s_pad - S))).reshape(-1)              # (B*s_pad,) SMEM

    gamma2 = gamma.reshape(1, E).astype(jnp.float32)
    beta2 = beta.reshape(1, E).astype(jnp.float32)

    use_mask = input_lengths is not None
    lens = (input_lengths.astype(jnp.int32) if use_mask
            else jnp.full((B,), S, dtype=jnp.int32))

    kernel = functools.partial(_embed_kernel,
                               embed_size=E, tile_s=tile_s, s_pad=s_pad,
                               pre_norm=pre_norm, use_mask=use_mask)

    grid_spec = pltpu.PrefetchScalarGridSpec(
        num_scalar_prefetch=2,                      # token ids + input_lengths -> SMEM
        grid=(num_s_tiles, B),                      # batch innermost: pos tile reused
        in_specs=[
            # embedding table: left in place (HBM), rows DMA-gathered in-kernel
            pl.BlockSpec(memory_space=pl.ANY),
            # positional-encoding rows for this sequence tile (constant over b)
            pl.BlockSpec((tile_s, E), lambda st, b, tok, ln: (st, 0)),
            # layernorm params (broadcast)
            pl.BlockSpec((1, E), lambda st, b, tok, ln: (0, 0)),
            pl.BlockSpec((1, E), lambda st, b, tok, ln: (0, 0)),
        ],
        out_specs=pl.BlockSpec((None, tile_s, E), lambda st, b, tok, ln: (b, st, 0)),
        scratch_shapes=[
            pltpu.VMEM((tile_s, E), jnp.float32),   # gathered embedding rows
            pltpu.SemaphoreType.DMA((1,)),          # row-gather completion sem
        ],
    )

    # ---- VMEM budget: tiny (no resident table); cap by the device capacity --
    vmem_need = (2 + 2 + 1) * tile_s * E * 4 + 4 * E * 4   # pos/out dbl-buf + rows + params
    try:
        vmem_cap = pltpu.get_tpu_info().vmem_capacity_bytes
    except Exception:
        vmem_cap = 64 << 20                                  # conservative (v7x per-TC)
    vmem_limit = int(min(max(4 * vmem_need, 16 << 20), vmem_cap - (8 << 20)))

    out = pl.pallas_call(
        kernel,
        out_shape=jax.ShapeDtypeStruct((B, s_pad, E), jnp.float32),
        grid_spec=grid_spec,
        compiler_params=pltpu.CompilerParams(
            dimension_semantics=("parallel", "parallel"),
            vmem_limit_bytes=vmem_limit),
    )(tok_p, lens, emb_f32, pos_p, gamma2, beta2)

    if s_pad != S:
        out = out[:, :S, :]
    return out


def make_positional_encoding(max_len, embed_size):
    pos = jnp.arange(max_len, dtype=jnp.float32)[:, None]          # (L, 1)
    i = jnp.arange(0, embed_size, 2, dtype=jnp.float32)            # (E/2,)
    denom = jnp.power(10000.0, i / embed_size)
    angle = pos / denom                                            # (L, E/2)
    pe = jnp.zeros((max_len, embed_size), dtype=jnp.float32)
    pe = pe.at[:, 0::2].set(jnp.sin(angle))
    pe = pe.at[:, 1::2].set(jnp.cos(angle))
    return pe


def reference_forward(tokens, emb_table, pos_enc, gamma, beta,
                      input_lengths=None, pre_norm=False, eps=1e-5):
    S = tokens.shape[1]
    E = emb_table.shape[1]
    out = emb_table[tokens] * math.sqrt(E) + pos_enc[None, :S, :]
    if input_lengths is not None:
        mask = (jnp.arange(S)[None, :] < input_lengths[:, None])[..., None]
        out = out * mask.astype(out.dtype)
    if pre_norm:
        mean = jnp.mean(out, axis=-1, keepdims=True)
        var = jnp.mean((out - mean) ** 2, axis=-1, keepdims=True)
        out = (out - mean) * lax.rsqrt(var + eps) * gamma + beta
    return out


if __name__ == "__main__":
    B, S, V, E, MAX_LEN, PAD = 2, 8, 64, 32, 16, 0

    key = jax.random.PRNGKey(0)
    k_emb, k_tok = jax.random.split(key)

    # nn.Embedding init ~ N(0,1); padding_idx row zeroed.
    emb_table = jax.random.normal(k_emb, (V, E), dtype=jnp.float32)
    emb_table = emb_table.at[PAD].set(0.0)
    # nn.LayerNorm default init.
    gamma = jnp.ones((E,), dtype=jnp.float32)
    beta = jnp.zeros((E,), dtype=jnp.float32)

    pos_enc = make_positional_encoding(MAX_LEN, E)

    tokens = jax.random.randint(k_tok, (B, S), 0, V, dtype=jnp.int32)
    input_lengths = jnp.array([8, 5], dtype=jnp.int32)
    # force actual PAD tokens past the lengths
    tokens = tokens * (jnp.arange(S)[None, :] < input_lengths[:, None])

    for pre_norm in (False, True):
        for lens in (None, input_lengths):
            out = embedding_layer_forward(tokens, emb_table, pos_enc, gamma, beta,
                                          input_lengths=lens, pre_norm=pre_norm)
            out = jax.block_until_ready(out)
            ref = reference_forward(tokens, emb_table, pos_enc, gamma, beta,
                                    input_lengths=lens, pre_norm=pre_norm)
            assert out.shape == (B, S, E)
            assert jnp.allclose(out, ref, atol=1e-5, rtol=1e-5), (
                f"mismatch (pre_norm={pre_norm}, mask={lens is not None})")

    print("KERNEL_OK")
</pallas_src>

<mosaic_0001>
module attributes {stable_mosaic.version = 11 : i64} {
  func.func @_embed_kernel(%arg0: i32, %arg1: i32, %arg2: memref<16xi32, #tpu.memory_space<smem>>, %arg3: memref<2xi32, #tpu.memory_space<smem>>, %arg4: memref<64x32xf32, #tpu.memory_space<any>>, %arg5: memref<8x32xf32, #tpu.memory_space<vmem>>, %arg6: memref<1x32xf32, #tpu.memory_space<vmem>>, %arg7: memref<1x32xf32, #tpu.memory_space<vmem>>, %arg8: memref<1x8x32xf32, #tpu.memory_space<vmem>>, %arg9: memref<8x32xf32, #tpu.memory_space<vmem>>, %arg10: memref<1x!tpu.dma_semaphore, #tpu.memory_space<semaphore_mem>>) attributes {dimension_semantics = [#tpu.dimension_semantics<parallel>, #tpu.dimension_semantics<parallel>], iteration_bounds = array<i64: 1, 2>, scalar_prefetch = 2 : i64, scratch_operands = 2 : i64, tpu.core_type = #tpu.core_type<tc>, window_params = [{}, {transform_indices = @transform_1, window_bounds = array<i64: 8, 32>}, {pipeline_mode = #tpu.pipeline_mode<synchronous>, transform_indices = @transform_2, window_bounds = array<i64: 1, 32>}, {pipeline_mode = #tpu.pipeline_mode<synchronous>, transform_indices = @transform_3, window_bounds = array<i64: 1, 32>}, {transform_indices = @transform_4, window_bounds = array<i64: 1, 8, 32>}]} {
    %c8_i32 = arith.constant 8 : i32
    %0 = arith.muli %arg1, %c8_i32 : i32
    %c8_i32_0 = arith.constant 8 : i32
    %1 = arith.muli %arg0, %c8_i32_0 : i32
    %2 = arith.addi %0, %1 : i32
    %c0_i32 = arith.constant 0 : i32
    %c8_i32_1 = arith.constant 8 : i32
    %3 = arith.addi %c0_i32, %c8_i32_1 : i32
    %c1_i32 = arith.constant 1 : i32
    scf.for %arg11 = %c0_i32 to %3 step %c1_i32  : i32 {
      %13 = arith.addi %2, %arg11 : i32
      %14 = arith.index_cast %13 : i32 to index
      %15 = memref.load %arg2[%14] : memref<16xi32, #tpu.memory_space<smem>>
      %c0_i32_13 = arith.constant 0 : i32
      %c0_i32_14 = arith.constant 0 : i32
      %16 = tpu.memref_slice %arg4[%15, %c0_i32_14] : memref<64x32xf32, #tpu.memory_space<any>> -> memref<1x32xf32, #tpu.memory_space<any>>
      %17 = tpu.memref_squeeze %16 : memref<1x32xf32, #tpu.memory_space<any>> -> memref<32xf32, #tpu.memory_space<any>>
      %c0_i32_15 = arith.constant 0 : i32
      %18 = tpu.memref_slice %arg9[%arg11, %c0_i32_15] : memref<8x32xf32, #tpu.memory_space<vmem>> -> memref<1x32xf32, #tpu.memory_space<vmem>>
      %19 = tpu.memref_squeeze %18 : memref<1x32xf32, #tpu.memory_space<vmem>> -> memref<32xf32, #tpu.memory_space<vmem>>
      %20 = tpu.memref_slice %arg10[%c0_i32_13] : memref<1x!tpu.dma_semaphore, #tpu.memory_space<semaphore_mem>> -> memref<1x!tpu.dma_semaphore, #tpu.memory_space<semaphore_mem>>
      %21 = tpu.memref_squeeze %20 : memref<1x!tpu.dma_semaphore, #tpu.memory_space<semaphore_mem>> -> memref<!tpu.dma_semaphore, #tpu.memory_space<semaphore_mem>>
      tpu.enqueue_dma source(%17 : memref<32xf32, #tpu.memory_space<any>>) target(%19 : memref<32xf32, #tpu.memory_space<vmem>>) target_semaphore(%21 : memref<!tpu.dma_semaphore, #tpu.memory_space<semaphore_mem>>)
    }
    %c8_i32_2 = arith.constant 8 : i32
    %c0_i32_3 = arith.constant 0 : i32
    %c8_i32_4 = arith.constant 8 : i32
    %4 = arith.addi %c0_i32_3, %c8_i32_4 : i32
    %c1_i32_5 = arith.constant 1 : i32
    scf.for %arg11 = %c0_i32_3 to %4 step %c1_i32_5  : i32 {
      %c0_i32_13 = arith.constant 0 : i32
      %c0_i32_14 = arith.constant 0 : i32
      %c0_i32_15 = arith.constant 0 : i32
      %13 = tpu.memref_slice %arg4[%c0_i32_13, %c0_i32_15] : memref<64x32xf32, #tpu.memory_space<any>> -> memref<1x32xf32, #tpu.memory_space<any>>
      %14 = tpu.memref_squeeze %13 : memref<1x32xf32, #tpu.memory_space<any>> -> memref<32xf32, #tpu.memory_space<any>>
      %c0_i32_16 = arith.constant 0 : i32
      %15 = tpu.memref_slice %arg9[%arg11, %c0_i32_16] : memref<8x32xf32, #tpu.memory_space<vmem>> -> memref<1x32xf32, #tpu.memory_space<vmem>>
      %16 = tpu.memref_squeeze %15 : memref<1x32xf32, #tpu.memory_space<vmem>> -> memref<32xf32, #tpu.memory_space<vmem>>
      %17 = tpu.memref_slice %arg10[%c0_i32_14] : memref<1x!tpu.dma_semaphore, #tpu.memory_space<semaphore_mem>> -> memref<1x!tpu.dma_semaphore, #tpu.memory_space<semaphore_mem>>
      %18 = tpu.memref_squeeze %17 : memref<1x!tpu.dma_semaphore, #tpu.memory_space<semaphore_mem>> -> memref<!tpu.dma_semaphore, #tpu.memory_space<semaphore_mem>>
      tpu.wait_dma2 semaphore(%18 : memref<!tpu.dma_semaphore, #tpu.memory_space<semaphore_mem>>) src(%14 : memref<32xf32, #tpu.memory_space<any>>) dst(%16 : memref<32xf32, #tpu.memory_space<vmem>>)
    }
    %c8_i32_6 = arith.constant 8 : i32
    %c0 = arith.constant 0 : index
    %c0_7 = arith.constant 0 : index
    %5 = vector.load %arg9[%c0, %c0_7] : memref<8x32xf32, #tpu.memory_space<vmem>>, vector<8x32xf32>
    %cst = arith.constant 5.65685415 : f32
    %6 = vector.broadcast %cst : f32 to vector<8x32xf32>
    %7 = arith.mulf %5, %6 : vector<8x32xf32>
    %c0_8 = arith.constant 0 : index
    %c0_9 = arith.constant 0 : index
    %8 = vector.load %arg5[%c0_8, %c0_9] : memref<8x32xf32, #tpu.memory_space<vmem>>, vector<8x32xf32>
    %9 = arith.addf %7, %8 : vector<8x32xf32>
    %c0_10 = arith.constant 0 : index
    %c0_11 = arith.constant 0 : index
    %c0_12 = arith.constant 0 : index
    %10 = vector.load %arg8[%c0_10, %c0_11, %c0_12] : memref<1x8x32xf32, #tpu.memory_space<vmem>>, vector<1x8x32xf32>
    %11 = vector.shape_cast %10 : vector<1x8x32xf32> to vector<8x32xf32>
    %12 = vector.shape_cast %9 : vector<8x32xf32> to vector<1x8x32xf32>
    tpu.vector_store %arg8[%c0_10, %c0_11, %c0_12], %12 {strides = array<i32>} : memref<1x8x32xf32, #tpu.memory_space<vmem>>, vector<1x8x32xf32>,
    return
  }
  func.func @transform_1(%arg0: i32, %arg1: i32, %arg2: memref<16xi32, #tpu.memory_space<smem>>, %arg3: memref<2xi32, #tpu.memory_space<smem>>) -> (i32, i32) {
    %c0_i32 = arith.constant 0 : i32
    %c0_i32_0 = arith.constant 0 : i32
    return %arg0, %c0_i32 : i32, i32
  }
  func.func @transform_2(%arg0: i32, %arg1: i32, %arg2: memref<16xi32, #tpu.memory_space<smem>>, %arg3: memref<2xi32, #tpu.memory_space<smem>>) -> (i32, i32) {
    %c0_i32 = arith.constant 0 : i32
    %c0_i32_0 = arith.constant 0 : i32
    %c0_i32_1 = arith.constant 0 : i32
    return %c0_i32, %c0_i32_0 : i32, i32
  }
  func.func @transform_3(%arg0: i32, %arg1: i32, %arg2: memref<16xi32, #tpu.memory_space<smem>>, %arg3: memref<2xi32, #tpu.memory_space<smem>>) -> (i32, i32) {
    %c0_i32 = arith.constant 0 : i32
    %c0_i32_0 = arith.constant 0 : i32
    %c0_i32_1 = arith.constant 0 : i32
    return %c0_i32, %c0_i32_0 : i32, i32
  }
  func.func @transform_4(%arg0: i32, %arg1: i32, %arg2: memref<16xi32, #tpu.memory_space<smem>>, %arg3: memref<2xi32, #tpu.memory_space<smem>>) -> (i32, i32, i32) {
    %c0_i32 = arith.constant 0 : i32
    %c0_i32_0 = arith.constant 0 : i32
    return %arg1, %arg0, %c0_i32 : i32, i32, i32
  }
}

</mosaic_0001>

<bundles_post_ra>
// kernel: tpu_custom_call.1
= control target key start
LH: loop header
LB: loop body
LE: loop exit
PB: predicated region body
PF: predicated region fallthrough
CT: control target
= control target key end

     0   :  { %s576_s4 = smov [#allocation5]   ;;  %s577_s27 = smov [#allocation6]   ;;  %s732_s0 = inlined_call_operand.vmem [shape: s32[16], index: 0, kind: input, shape index: {}]   ;;  %s733_s2 = inlined_call_operand.vmem [shape: f32[64,32], index: 2, kind: input, shape index: {}]   ;;  %s734_s3 = inlined_call_operand.vmem [shape: f32[8,32], index: 3, kind: input, shape index: {}]   ;;  %s735_s4 = inlined_call_operand.vmem [shape: f32[1,32], index: 4, kind: input, shape index: {}]   ;;  %s736_s5 = inlined_call_operand.vmem [shape: f32[1,32], index: 5, kind: input, shape index: {}]   ;;  %s737_s6 = inlined_call_operand.hbm [shape: f32[2,8,32], index: 6, kind: output, shape index: {}]   ;;  %s738_s1 = inlined_call_operand.vmem [shape: s32[2], index: 1, kind: input, shape index: {}]  }
   0x1   :  { %s12_s23 = sshll.u32 %s732_s0, 4  ;;  %s17_s26 = sshll.u32 %s738_s1, 4  ;;  %s13_s23 = int_to_ptr.vmem [resolvable:$true] %s12_s23  ;;  %s18_s26 = int_to_ptr.vmem [resolvable:$true] %s17_s26 }
   0x2   :  { %15 = dma.vmem_to_smem %s13_s23, 16, %s576_s4, [#allocation4] }
   0x3   :  { %20 = dma.vmem_to_smem %s18_s26, 16, %s577_s27, [#allocation4] }
   0x4   :  { %536 = dma.done.wait [#allocation4], 32 }
   0x5   :  { %537 = vsyncadd [#allocation4], 4294967264 }
   0x6   :  { %23 = sfence }
   0x7   :  { %24 = vsyncpa [#allocation8], 0 }
   0x8   :  { %26 = vsyncpa [#allocation8 + $0x1], 0  ;;  %s619_s5 = smov 0   ;;  %s621_s28 = smov 0  }
   0x9   :  { %s623_s0 = smov 0   ;;  %s625_s29 = smov 0  }
   0xa   :  { %s627_s1 = smov 0   ;;  %s629_s30 = smov 0  }
   0xb LB: > { %s367_s7 = sadd.s32 4294967295, %s566_s30   ;;  %s368_s8 = sadd.s32 4294967294, %s566_s30   ;;  %s566_s30 = sphi %s629_s30, %s32_s30   ;;  %s562_s1 = sphi %s627_s1, %s745_s1   ;;  %s558_s29 = sphi %s625_s29, %s744_s29   ;;  %s554_s0 = sphi %s623_s0, %s743_s0   ;;  %s550_s28 = sphi %s621_s28, %s742_s28   ;;  %s546_s5 = sphi %s619_s5, %s741_s5  }
   0xc   : > { %s41_s9 = sadd.s32 1, %s562_s1  ;;  %s121_s10 = sadd.s32 1, %s554_s0 }
   0xd   : > { %p42_p0 = scmp.ge.s32.totalorder %s41_s9, 2  ;;  %p131_p1 = scmp.ne.s32.totalorder %s554_s0, %s550_s28 }
   0xe   : > { %p132_p2 = scmp.eq.s32.totalorder %s367_s7, 1  ;;  %p137_p3 = scmp.ne.s32.totalorder %s550_s28, %s546_s5 }
   0xf   : > { %s747_s9 = smov (%p42_p0, %s41_s9), 0  ;;  %p138_p5 = scmp.eq.s32.totalorder %s368_s8, 1 }
  0x10   : > { %p659_p4 = por %p132_p2, %p131_p1  ;;  %s116_s12 = ssub.s32 %s562_s1, %s747_s9 }
  0x11   : > { %p371_p6 = scmp.ge.s32.totalorder %s566_s30, 1  ;;  %p119_p7 = scmp.eq.s32.totalorder %s116_s12, 0 }
  0x12   : > { %p666_p8 = por %p138_p5, %p137_p3  ;;  %p169_p9 = scmp.lt.s32.totalorder %s566_s30, 3 }
  0x13   : > { %s672_s14 = scalar_select %p119_p7, %s554_s0, %s121_s10  }
  0x14   : > { %p170_p10 = pnand %p371_p6, %p169_p9 }
  0x15   : > { %s189_s15 = sand.u32 (!%p170_p10), 1, %s550_s28   ;;  %s373_s16 = sshll.u32 (!%p170_p10), %s558_s29, 3 }
  0x16   : > { %173 = sbr.rel (%p170_p10) target bundleno = 62 (0x3e), region = 32  ;;  %s678_s17 = sshll.u32 (!%p170_p10), %s189_s15, 3 }
  0x17   : > { %s191_s18 = scalar_lea.vmem (!%p170_p10), [#allocation7], %s678_s17  ;;  %s568_s19 = smov (!%p170_p10), 0  }
  0x1b LB: >> { %s205_s20 = sadd.s32 %s570_s19, %s373_s16  ;;  %s208_s25 = scalar_lea.vmem [#allocation2], %s570_s19  ;;  %s570_s19 = sphi %s568_s19, %s204_s19  }
  0x1c   : >> { %s206_s21 = sld [smem:[#allocation5 + %s205_s20]] }
  0x22   : >> { %s207_s24 = scalar_lea.vmem %s733_s2, %s206_s21 }
  0x23   : >> { %v223_v0 = vld [vmem:[%s207_s24] sm:$0x1] }
  0x24   : >> { %224 = vst [vmem:[%s208_s25] sm:$0x1] %v223_v0 }
  0x25   : >> { %242 = vsyncadd [#allocation3], 16  ;;  %s204_s19 = sadd.s32 1, %s570_s19  }
  0x26   : >> { %p201_p11 = scmp.ge.s32.totalorder %s204_s19, 8  }
  0x27   : > { %s572_s26 = smov (%p201_p11), 0  }
  0x28   : > { %203 = sbr.rel (!%p201_p11) target bundleno = 27 (0x1b), region = 117 }
  0x2d LB: >> { %538 = dma.done.wait [#allocation3], 16  ;;  %s574_s26 = sphi %s572_s26, %s248_s26  }
  0x2e   : >> { %539 = vsyncadd [#allocation3], 4294967280  ;;  %s248_s26 = sadd.s32 1, %s574_s26  }
  0x2f   : >> { %p245_p12 = scmp.ge.s32.totalorder %s248_s26, 8  }
  0x30   : > { %v251_v1 = vld [vmem:[#allocation2] sm:$0xff] (%p245_p12)  ;;  %s269_s10 = scalar_lea.hbm (%p245_p12), %s737_s6, %s373_s16  ;;  %s271_s12 = sshll.u32 (%p245_p12), %s191_s18, 4  ;;  %vm255_vm0 = vcmask (%p245_p12), 261120   ;;  %s272_s12 = int_to_ptr.vmem [resolvable:$true] %s271_s12 }
  0x31   : > { %247 = sbr.rel (!%p245_p12) target bundleno = 45 (0x2d), region = 128  ;;  %v253_v2 = vld [vmem:[%s734_s3] sm:$0xff] (%p245_p12)  ;;  %v252_v3 = vmul.f32 (%p245_p12), 5.656854, %v251_v1  ;;  %s273_s19 = sshll.u32 (%p245_p12), %s269_s10, 4  ;;  %s274_s19 = int_to_ptr.hbm [resolvable:$true] %s273_s19 }
  0x32   : > { %s258_s20 = scalar_lea.sflag (%p245_p12), [#allocation8], %s189_s15  ;;  %s490_s21 = sshra.s32 (%p245_p12), %s274_s19, 4  ;;  %s491_s21 = int_to_ptr.hbm [resolvable:$true] %s490_s21 }
  0x33   : > { %v254_v4 = vadd.f32 (%p245_p12), %v253_v2, %v252_v3  ;;  %s492_s22 = scalar_lea.hbm (%p245_p12), %s491_s21, 8  ;;  %s496_s23 = scalar_lea.hbm (%p245_p12), %s737_s6, 16 }
  0x34   : > { %p493_p13 = scmp.ne.s32.totalorder (%p245_p12), %s491_s21, %s492_s22  ;;  %p497_p2 = scmp.lt.s32.totalorder (%p245_p12), %s491_s21, %s737_s6 }
  0x35   : > { %256 = vst.msk [vmem:[%s191_s18] sm:$0xff] (%p245_p12), %vm255_vm0, %v254_v4  ;;  %p498_p3 = scmp.lt.s32.totalorder (%p245_p12), %s496_s23, %s492_s22 }
  0x36   : > { %p494_p0 = pnand %p493_p13, %p659_p4 }
  0x37   : > { %p499_p5 = por %p498_p3, %p497_p2 }
  0x38   : > { %p495_p1 = pneg %p494_p0 }
  0x3a   : > { %p500_p6 = pnand %p499_p5, %p495_p1 }
  0x3c   : > { %503 = shalt.err (!%p500_p6)
}
  0x3d   : > { %379 = dma.vmem_to_hbm [thread:$0]  (%p659_p4), %s272_s12, 128, %s274_s19, %s258_s20  }
  0x3e PF: > { %p385_p7 = scmp.ge.s32.totalorder %s566_s30, 2  ;;  %s285_s15 = sand.u32 1, %s546_s5  }
  0x3f   : > { %s286_s17 = scalar_lea.sflag [#allocation8], %s285_s15 }
  0x40   : > { %p382_p9 = pnand %p385_p7, %p666_p8 }
  0x42   : > { %p383_p10 = pneg %p382_p9 }
  0x44   : > { %541 = dma.done.wait (%p383_p10), %s286_s17, 128  }
  0x45   : > { %543 = vsyncadd (%p383_p10), %s286_s17, 4294967168  ;;  %s32_s30 = sadd.s32 1, %s566_s30   ;;  %s741_s5 = smov %s550_s28 }
  0x46   : > { %p29_p11 = scmp.ge.s32.totalorder %s32_s30, 4   ;;  %s742_s28 = smov %s554_s0 }
  0x47   : > { %s743_s0 = smov %s672_s14  ;;  %s744_s29 = smov %s562_s1 }
  0x48   : > { %s745_s1 = smov %s747_s9  ;;  %31 = sbr.rel (!%p29_p11) target bundleno = 11 (0xb), region = 139 }
  0x4d   :  { %292 = vsyncpa [#allocation8], 1 }
  0x4e   :  { %294 = vsyncpa [#allocation8 + $0x1], 1 }
  0x4f   :  { %295 = vsyncmov [#allocation3] }
  0x52   :  { %s296_s11 = vpop.sfrf %295 }
  0x53   :  { %p378_p4 = scmp.ne.s32.totalorder %s296_s11, 0 }
  0x55   :  { %300 = shalt.err (%p378_p4)  }

</bundles_post_ra>
